<compile_context>
chip_gen: v7x
topology: tpu7x:2x2x1
jax: 0.10.0
libtpu: 0.0.40
codegen_flags: <defaults>
</compile_context>

<pallas_src>
import functools

import numpy as np
import jax
import jax.numpy as jnp
from jax.experimental import pallas as pl
from jax.experimental.pallas import tpu as pltpu


def features_linear_kernel(xT_ref, table_ref, bias_ref, out_ref, *,
                           field_dims_pad, offsets_pad, max_dim):
    # xT_ref:    (F, TB)     int32  per-field local indices, batch on lanes
    # table_ref: (V_pad, 1)  f32    resident across the grid (8-row aligned segs)
    # bias_ref:  (1,)        f32    scalar in SMEM
    # out_ref:   (1, TB)     f32    lane-dense output block
    tb = out_ref.shape[-1]
    xall = xT_ref[...]                                              # one block load
    tab = table_ref[...]                                            # one block load
    iota = jax.lax.broadcasted_iota(jnp.int32, (max_dim, tb), 0)    # hoisted once
    acc = jnp.zeros((1, tb), dtype=jnp.float32)
    for f, (off, dim) in enumerate(zip(offsets_pad, field_dims_pad)):
        xloc = xall[f:f + 1, :]                                     # (1, TB) in-reg row
        hit = iota[:dim, :] == xloc                                 # (dim, TB) bool
        tcol = tab[off:off + dim, 0:1]                              # (dim, 1) aligned view
        # Select matching table row per lane, reduce over sublanes (XLU).
        acc = acc + jnp.sum(jnp.where(hit, tcol, 0.0), axis=0, keepdims=True)
    out_ref[...] = acc + bias_ref[0]                                # scalar bias broadcast


def features_linear(x, table, bias, field_dims, *, tb=None):
    """FM linear term.

    x:     (B, F) integer per-field indices (x[:, f] in [0, field_dims[f]))
    table: (V, 1) float32 embedding table, V = sum(field_dims)
    bias:  (1,)   float32
    returns (B, 1) float32
    """
    field_dims = tuple(int(d) for d in field_dims)
    F = len(field_dims)
    offsets = tuple(int(o) for o in (0, *np.cumsum(field_dims)[:-1]))
    B, Fx = x.shape
    assert Fx == F
    V, D = table.shape
    assert V == sum(field_dims)
    assert D == 1  # module default output_dim == 1

    # --- Sublane-align (multiple of 8) each field's table segment. ---
    field_dims_pad = tuple(8 * pl.cdiv(d, 8) for d in field_dims)
    offsets_pad = tuple(int(o) for o in (0, *np.cumsum(field_dims_pad)[:-1]))
    v_pad = int(sum(field_dims_pad))
    table_pad = jnp.zeros((v_pad, 1), dtype=jnp.float32)
    for d, o, op in zip(field_dims, offsets, offsets_pad):
        table_pad = table_pad.at[op:op + d, :].set(table[o:o + d, :].astype(jnp.float32))

    # --- Batch tile: large enough to amortize per-grid-step overhead, but keep
    # >= 2 grid steps when the padded batch allows (megacore / v7x 2 TCs). ---
    if tb is None:
        b128 = 128 * pl.cdiv(B, 128)
        tb = min(1024, b128)
        if b128 // tb < 2 and b128 >= 256:
            tb = max(128, 128 * ((b128 // 2) // 128))
    b_pad = tb * pl.cdiv(B, tb)

    # Padded batch lanes [B, b_pad) carry index 0 -> garbage sums, sliced off below.
    xT = jnp.pad(x.astype(jnp.int32).T, ((0, 0), (0, b_pad - B)))   # (F, b_pad)
    bias1d = jnp.asarray(bias, dtype=jnp.float32).reshape(1)

    kernel = functools.partial(features_linear_kernel,
                               field_dims_pad=field_dims_pad,
                               offsets_pad=offsets_pad,
                               max_dim=max(field_dims_pad))
    outT = pl.pallas_call(
        kernel,
        out_shape=jax.ShapeDtypeStruct((1, b_pad), jnp.float32),
        grid_spec=pltpu.PrefetchScalarGridSpec(
            num_scalar_prefetch=0,
            grid=(b_pad // tb,),
            in_specs=[
                pl.BlockSpec((F, tb), lambda i: (0, i)),          # x tile (pipelined)
                pl.BlockSpec((v_pad, 1), lambda i: (0, 0)),       # table (VMEM-resident)
                pl.BlockSpec(memory_space=pltpu.MemorySpace.SMEM),  # bias scalar
            ],
            out_specs=pl.BlockSpec((1, tb), lambda i: (0, i)),    # lane-dense output
        ),
        compiler_params=pltpu.CompilerParams(
            dimension_semantics=("parallel",)),
        cost_estimate=pl.CostEstimate(
            flops=2 * b_pad * v_pad,
            transcendentals=0,
            bytes_accessed=xT.size * 4 + v_pad * 4 + 4 + b_pad * 4),
    )(xT, table_pad, bias1d)
    return outT[0, :B].reshape(B, 1)


if __name__ == "__main__":
    # Small, deterministic setup consistent with the module's __init__.
    field_dims = (4, 8, 16, 32)            # sum(field_dims) = 60 embedding rows
    output_dim = 1
    F = len(field_dims)
    V = int(sum(field_dims))

    key = jax.random.PRNGKey(0)
    k_tab, k_bias, k_x1, k_x2, k_x3 = jax.random.split(key, 5)

    # torch.nn.Embedding default init ~ N(0, 1); bias is a learned parameter.
    table = jax.random.normal(k_tab, (V, output_dim), dtype=jnp.float32)
    bias = 0.1 * jax.random.normal(k_bias, (output_dim,), dtype=jnp.float32)

    offsets = jnp.asarray((0, *np.cumsum(field_dims)[:-1]), dtype=jnp.int32)
    maxvals = jnp.asarray(field_dims, dtype=jnp.int32)

    def make_x(k, batch):
        u = jax.random.uniform(k, (batch, F), dtype=jnp.float32)
        return jnp.floor(u * maxvals.astype(jnp.float32)[None, :]).astype(jnp.int32)

    # batch=8: single padded tile; batch=200: tile cap keeps 2 grid steps;
    # batch=1500: larger tile (tb > 128) + 2 grid steps + ragged padding.
    for k, batch in ((k_x1, 8), (k_x2, 200), (k_x3, 1500)):
        x = make_x(k, batch)
        out = jax.block_until_ready(features_linear(x, table, bias, field_dims))
        # Plain-JAX reference for correctness.
        ref = jnp.sum(table[x + offsets[None, :]], axis=1) + bias       # (batch, 1)
        assert out.shape == (batch, output_dim)
        assert bool(jnp.allclose(out, ref, atol=1e-5, rtol=1e-5)), f"mismatch at batch={batch}"
    print("KERNEL_OK")
</pallas_src>

<mosaic_0001>
module attributes {stable_mosaic.version = 11 : i64} {
  func.func @features_linear_kernel(%arg0: i32, %arg1: memref<4x128xi32, #tpu.memory_space<vmem>>, %arg2: memref<64x1xf32, #tpu.memory_space<vmem>>, %arg3: memref<1xf32, #tpu.memory_space<smem>>, %arg4: memref<1x128xf32, #tpu.memory_space<vmem>>) attributes {dimension_semantics = [#tpu.dimension_semantics<parallel>], iteration_bounds = array<i64: 1>, scalar_prefetch = 0 : i64, scratch_operands = 0 : i64, tpu.core_type = #tpu.core_type<tc>, window_params = [{transform_indices = @transform_0, window_bounds = array<i64: 4, 128>}, {pipeline_mode = #tpu.pipeline_mode<synchronous>, transform_indices = @transform_1, window_bounds = array<i64: 64, 1>}, {transform_indices = @transform_2, window_bounds = array<i64: 1>}, {transform_indices = @transform_3, window_bounds = array<i64: 1, 128>}]} {
    %c0 = arith.constant 0 : index
    %c0_0 = arith.constant 0 : index
    %0 = vector.load %arg1[%c0, %c0_0] : memref<4x128xi32, #tpu.memory_space<vmem>>, vector<4x128xi32>
    %c0_1 = arith.constant 0 : index
    %c0_2 = arith.constant 0 : index
    %1 = vector.load %arg2[%c0_1, %c0_2] : memref<64x1xf32, #tpu.memory_space<vmem>>, vector<64x1xf32>
    %2 = tpu.iota {dimensions = array<i32: 0>} : vector<32x128xi32>
    %cst = arith.constant 0.000000e+00 : f32
    %3 = vector.broadcast %cst : f32 to vector<1x128xf32>
    %4 = vector.extract_strided_slice %0 {offsets = [0, 0], sizes = [1, 128], strides = [1, 1]} : vector<4x128xi32> to vector<1x128xi32>
    %5 = vector.extract_strided_slice %2 {offsets = [0, 0], sizes = [8, 128], strides = [1, 1]} : vector<32x128xi32> to vector<8x128xi32>
    %6 = vector.broadcast %4 : vector<1x128xi32> to vector<8x128xi32>
    %7 = arith.cmpi eq, %5, %6 : vector<8x128xi32>
    %8 = vector.extract_strided_slice %1 {offsets = [0, 0], sizes = [8, 1], strides = [1, 1]} : vector<64x1xf32> to vector<8x1xf32>
    %cst_3 = arith.constant 0.000000e+00 : f32
    %9 = vector.shape_cast %8 : vector<8x1xf32> to vector<8x1xf32>
    %10 = vector.broadcast %9 : vector<8x1xf32> to vector<8x128xf32>
    %11 = vector.broadcast %cst_3 : f32 to vector<8x128xf32>
    %12 = arith.select %7, %10, %11 : vector<8x128xi1>, vector<8x128xf32>
    %cst_4 = arith.constant dense<0.000000e+00> : vector<128xf32>
    %13 = vector.multi_reduction <add>, %12, %cst_4 [0] : vector<8x128xf32> to vector<128xf32>
    %14 = vector.shape_cast %13 : vector<128xf32> to vector<1x128xf32>
    %15 = arith.addf %3, %14 : vector<1x128xf32>
    %16 = vector.extract_strided_slice %0 {offsets = [1, 0], sizes = [1, 128], strides = [1, 1]} : vector<4x128xi32> to vector<1x128xi32>
    %17 = vector.extract_strided_slice %2 {offsets = [0, 0], sizes = [8, 128], strides = [1, 1]} : vector<32x128xi32> to vector<8x128xi32>
    %18 = vector.broadcast %16 : vector<1x128xi32> to vector<8x128xi32>
    %19 = arith.cmpi eq, %17, %18 : vector<8x128xi32>
    %20 = vector.extract_strided_slice %1 {offsets = [8, 0], sizes = [8, 1], strides = [1, 1]} : vector<64x1xf32> to vector<8x1xf32>
    %cst_5 = arith.constant 0.000000e+00 : f32
    %21 = vector.shape_cast %20 : vector<8x1xf32> to vector<8x1xf32>
    %22 = vector.broadcast %21 : vector<8x1xf32> to vector<8x128xf32>
    %23 = vector.broadcast %cst_5 : f32 to vector<8x128xf32>
    %24 = arith.select %19, %22, %23 : vector<8x128xi1>, vector<8x128xf32>
    %cst_6 = arith.constant dense<0.000000e+00> : vector<128xf32>
    %25 = vector.multi_reduction <add>, %24, %cst_6 [0] : vector<8x128xf32> to vector<128xf32>
    %26 = vector.shape_cast %25 : vector<128xf32> to vector<1x128xf32>
    %27 = arith.addf %15, %26 : vector<1x128xf32>
    %28 = vector.extract_strided_slice %0 {offsets = [2, 0], sizes = [1, 128], strides = [1, 1]} : vector<4x128xi32> to vector<1x128xi32>
    %29 = vector.extract_strided_slice %2 {offsets = [0, 0], sizes = [16, 128], strides = [1, 1]} : vector<32x128xi32> to vector<16x128xi32>
    %30 = vector.broadcast %28 : vector<1x128xi32> to vector<16x128xi32>
    %31 = arith.cmpi eq, %29, %30 : vector<16x128xi32>
    %32 = vector.extract_strided_slice %1 {offsets = [16, 0], sizes = [16, 1], strides = [1, 1]} : vector<64x1xf32> to vector<16x1xf32>
    %cst_7 = arith.constant 0.000000e+00 : f32
    %33 = vector.shape_cast %32 : vector<16x1xf32> to vector<16x1xf32>
    %34 = vector.broadcast %33 : vector<16x1xf32> to vector<16x128xf32>
    %35 = vector.broadcast %cst_7 : f32 to vector<16x128xf32>
    %36 = arith.select %31, %34, %35 : vector<16x128xi1>, vector<16x128xf32>
    %cst_8 = arith.constant dense<0.000000e+00> : vector<128xf32>
    %37 = vector.multi_reduction <add>, %36, %cst_8 [0] : vector<16x128xf32> to vector<128xf32>
    %38 = vector.shape_cast %37 : vector<128xf32> to vector<1x128xf32>
    %39 = arith.addf %27, %38 : vector<1x128xf32>
    %40 = vector.extract_strided_slice %0 {offsets = [3, 0], sizes = [1, 128], strides = [1, 1]} : vector<4x128xi32> to vector<1x128xi32>
    %41 = vector.broadcast %40 : vector<1x128xi32> to vector<32x128xi32>
    %42 = arith.cmpi eq, %2, %41 : vector<32x128xi32>
    %43 = vector.extract_strided_slice %1 {offsets = [32, 0], sizes = [32, 1], strides = [1, 1]} : vector<64x1xf32> to vector<32x1xf32>
    %cst_9 = arith.constant 0.000000e+00 : f32
    %44 = vector.shape_cast %43 : vector<32x1xf32> to vector<32x1xf32>
    %45 = vector.broadcast %44 : vector<32x1xf32> to vector<32x128xf32>
    %46 = vector.broadcast %cst_9 : f32 to vector<32x128xf32>
    %47 = arith.select %42, %45, %46 : vector<32x128xi1>, vector<32x128xf32>
    %cst_10 = arith.constant dense<0.000000e+00> : vector<128xf32>
    %48 = vector.multi_reduction <add>, %47, %cst_10 [0] : vector<32x128xf32> to vector<128xf32>
    %49 = vector.shape_cast %48 : vector<128xf32> to vector<1x128xf32>
    %50 = arith.addf %39, %49 : vector<1x128xf32>
    %c0_11 = arith.constant 0 : index
    %51 = memref.load %arg3[%c0_11] : memref<1xf32, #tpu.memory_space<smem>>
    %52 = vector.broadcast %51 : f32 to vector<1x128xf32>
    %53 = arith.addf %50, %52 : vector<1x128xf32>
    %c0_12 = arith.constant 0 : index
    %c0_13 = arith.constant 0 : index
    %54 = vector.load %arg4[%c0_12, %c0_13] : memref<1x128xf32, #tpu.memory_space<vmem>>, vector<1x128xf32>
    tpu.vector_store %arg4[%c0_12, %c0_13], %53 {strides = array<i32>} : memref<1x128xf32, #tpu.memory_space<vmem>>, vector<1x128xf32>,
    return
  }
  func.func @transform_0(%arg0: i32) -> (i32, i32) {
    %c0_i32 = arith.constant 0 : i32
    %c0_i32_0 = arith.constant 0 : i32
    return %c0_i32, %arg0 : i32, i32
  }
  func.func @transform_1(%arg0: i32) -> (i32, i32) {
    %c0_i32 = arith.constant 0 : i32
    %c0_i32_0 = arith.constant 0 : i32
    %c0_i32_1 = arith.constant 0 : i32
    return %c0_i32, %c0_i32_0 : i32, i32
  }
  func.func @transform_2(%arg0: i32) -> i32 {
    %c0_i32 = arith.constant 0 : i32
    %c0_i32_0 = arith.constant 0 : i32
    return %c0_i32 : i32
  }
  func.func @transform_3(%arg0: i32) -> (i32, i32) {
    %c0_i32 = arith.constant 0 : i32
    %c0_i32_0 = arith.constant 0 : i32
    return %c0_i32, %arg0 : i32, i32
  }
}

</mosaic_0001>

<bundles_post_ra>
// kernel: tpu_custom_call.1
= control target key start
LH: loop header
LB: loop body
LE: loop exit
PB: predicated region body
PF: predicated region fallthrough
CT: control target
= control target key end

     0   :  { %v180_v2 = vmov 0   ;;  %s244_s0 = inlined_call_operand.vmem [shape: s32[4,128], index: 0, kind: input, shape index: {}]   ;;  %s245_s1 = inlined_call_operand.vmem [shape: f32[64,1], index: 1, kind: input, shape index: {}]   ;;  %s246_s2 = inlined_call_operand.<no memory space> [shape: f32[1], index: 2, kind: input, shape index: {}]   ;;  %s247_s3 = inlined_call_operand.hbm [shape: f32[1,128], index: 3, kind: output, shape index: {}]  }
   0x1   :  { %v21_v0 = vld [vmem:[%s245_s1 + $0x20] sm:$0xff]  ;;  %155 = vset.pattern.permute.xlu1 %v180_v2  ;;  %154 = vset.pattern.permute.xlu0 %v180_v2  ;;  %v22_v3 = vld [vmem:[%s245_s1 + $0x28] sm:$0xff] }
   0x2   :  { %v17_v1 = vld [vmem:[%s245_s1] sm:$0xff]  ;;  %102 = vperm.xlu0 %154, %v21_v0   ;;  %v18_v4 = vld [vmem:[%s245_s1 + $0x8] sm:$0xff] }
   0x3   :  { %37 = vperm.xlu1 %155, %v17_v1  }
   0x4   :  { %9 = vsyncpa [#allocation4], 0  ;;  %v19_v5 = vld [vmem:[%s245_s1 + $0x10] sm:$0xff]  ;;  %v20_v6 = vld [vmem:[%s245_s1 + $0x18] sm:$0xff]  ;;  %v25_v9 = vlaneseq  ;;  %s181_s30 = smov [#allocation3]  }
   0x5   :  { %v23_v7 = vld [vmem:[%s245_s1 + $0x30] sm:$0xff]  ;;  %v24_v8 = vld [vmem:[%s245_s1 + $0x38] sm:$0xff]  ;;  %v16_v12 = vld [vmem:[%s244_s0] sm:$0xf]  ;;  %s144_s4 = sshll.u32 %s181_s30, 4  ;;  %s145_s4 = int_to_ptr.vmem [resolvable:$true] %s144_s4 }
   0x6   :  { %107 = vperm.xlu0 %154, %v22_v3   ;;  %v26_v10 = vshrl.u32 %v25_v9, 7  ;;  %s156_s5 = scalar_lea.vmem %s145_s4, 16  ;;  %s160_s6 = scalar_lea.vmem %s145_s4, 32 }
   0x7   :  { %55 = vperm.xlu1 %155, %v18_v4   ;;  %p157_p0 = scmp.ne.s32.totalorder %s145_s4, %s156_s5  ;;  %p161_p1 = scmp.lt.s32.totalorder %s145_s4, %s145_s4 }
   0x8   :  { %v32_v11 = vsub.s32 0, %v26_v10  ;;  %v50_v14 = vsub.s32 1, %v26_v10  ;;  %v68_v16 = vsub.s32 2, %v26_v10  ;;  %v94_v17 = vsub.s32 3, %v26_v10  ;;  %p162_p2 = scmp.lt.s32.totalorder %s160_s6, %s156_s5 }
   0x9   :  { %v27_v21 = vadd.s32 8, %v26_v10  ;;  %v28_v29 = vadd.s32 16, %v26_v10  ;;  %v29_v34 = vadd.s32 24, %v26_v10 }
   0xa   :  { %74 = vperm.xlu0 %154, %v19_v5   ;;  %v33_v13 = vrot.slane %v16_v12, %v32_v11  ;;  %v51_v15 = vrot.slane %v16_v12, %v50_v14  ;;  %v69_v22 = vrot.slane %v16_v12, %v68_v16  ;;  %v95_v23 = vrot.slane %v16_v12, %v94_v17  ;;  %p163_p3 = por %p162_p2, %p161_p1 }
   0xb   :  { %79 = vperm.xlu1 %155, %v20_v6   ;;  %v135_v5 = vstv %s246_s2 }
   0xc   :  { %vm34_vm0 = vcmp.eq.s32.totalorder %v26_v10, %v33_v13  ;;  %vm52_vm1 = vcmp.eq.s32.totalorder %v26_v10, %v51_v15  ;;  %vm97_vm2 = vcmp.eq.s32.totalorder %v27_v21, %v95_v23  ;;  %vm70_vm3 = vcmp.eq.s32.totalorder %v26_v10, %v69_v22  ;;  %p164_p4 = pnand %p163_p3, %p157_p0 }
   0xd   :  { %vm71_vm4 = vcmp.eq.s32.totalorder %v27_v21, %v69_v22  ;;  %vm96_vm5 = vcmp.eq.s32.totalorder %v26_v10, %v95_v23  ;;  %vm98_vm6 = vcmp.eq.s32.totalorder %v28_v29, %v95_v23  ;;  %vm99_vm7 = vcmp.eq.s32.totalorder %v29_v34, %v95_v23 }
   0xe   :  { %112 = vperm.xlu0 %154, %v23_v7  }
   0xf   :  { %117 = vperm.xlu1 %155, %v24_v8  }
  0x81   :  { %v103_v18 = vpop.permute.xlu0 %102 }
  0x82   :  { %v38_v19 = vpop.permute.xlu1 %37  ;;  %v120_v40 = vsel %vm96_vm5, %v103_v18, 0.0 }
  0x83   :  { %v40_v20 = vsel %vm34_vm0, %v38_v19, 0.0 }
  0x84   :  { %v41_v24 = vrot.slane %v40_v20, 4 }
  0x85   :  { %v108_v25 = vpop.permute.xlu0 %107 }
  0x86   :  { %v56_v26 = vpop.permute.xlu1 %55  ;;  %v42_v30 = vadd.f32 %v41_v24, %v40_v20  ;;  %v121_v35 = vsel %vm97_vm2, %v108_v25, 0.0 }
  0x87   :  { %v58_v27 = vsel %vm52_vm1, %v56_v26, 0.0  ;;  %v124_v42 = vadd.f32 %v121_v35, %v120_v40 }
  0x88   :  { %v59_v28 = vrot.slane %v58_v27, 4  ;;  %v43_v41 = vrot.slane %v42_v30, 2 }
  0x89   :  { %v75_v32 = vpop.permute.xlu0 %74 }
  0x8a   :  { %v60_v31 = vadd.f32 %v59_v28, %v58_v27  ;;  %v80_v33 = vpop.permute.xlu1 %79  ;;  %v82_v36 = vsel %vm70_vm3, %v75_v32, 0.0  ;;  %v44_v51 = vadd.f32 %v43_v41, %v42_v30 }
  0x8b   :  { %v83_v37 = vsel %vm71_vm4, %v80_v33, 0.0 }
  0x8c   :  { %v61_v38 = vrot.slane %v60_v31, 2  ;;  %v84_v39 = vadd.f32 %v83_v37, %v82_v36  ;;  %v45_v57 = vrot.slane %v44_v51, 1 }
  0x8d   :  { %v113_v44 = vpop.permute.xlu0 %112 }
  0x8e   :  { %v85_v43 = vrot.slane %v84_v39, 4  ;;  %v118_v45 = vpop.permute.xlu1 %117  ;;  %v122_v46 = vsel %vm98_vm6, %v113_v44, 0.0  ;;  %v62_v47 = vadd.f32 %v61_v38, %v60_v31  ;;  %v46_v62 = vadd.f32 %v45_v57, %v44_v51 }
  0x8f   :  { %v125_v49 = vadd.f32 %v124_v42, %v122_v46  ;;  %v123_v50 = vsel %vm99_vm7, %v118_v45, 0.0 }
  0x90   :  { %v86_v48 = vadd.f32 %v85_v43, %v84_v39  ;;  %v63_v54 = vrot.slane %v62_v47, 1 }
  0x91   :  { %v126_v53 = vadd.f32 %v125_v49, %v123_v50 }
  0x92   :  { %v87_v52 = vrot.slane %v86_v48, 2  ;;  %v64_v60 = vadd.f32 %v63_v54, %v62_v47 }
  0x93   :  { %v127_v56 = vrot.slane %v126_v53, 4 }
  0x94   :  { %v88_v55 = vadd.f32 %v87_v52, %v86_v48  ;;  %v65_v1 = vadd.f32 %v64_v60, %v46_v62 }
  0x95   :  { %v128_v59 = vadd.f32 %v127_v56, %v126_v53 }
  0x96   :  { %v89_v58 = vrot.slane %v88_v55, 1 }
  0x97   :  { %v129_v61 = vrot.slane %v128_v59, 2 }
  0x98   :  { %v90_v63 = vadd.f32 %v89_v58, %v88_v55 }
  0x99   :  { %v130_v0 = vadd.f32 %v129_v61, %v128_v59 }
  0x9a   :  { %v91_v3 = vadd.f32 %v90_v63, %v65_v1 }
  0x9b   :  { %v131_v2 = vrot.slane %v130_v0, 1 }
  0x9d   :  { %v132_v4 = vadd.f32 %v131_v2, %v130_v0 }
  0x9f   :  { %v133_v6 = vadd.f32 %v132_v4, %v91_v3 }
  0xa1   :  { %v136_v7 = vadd.f32 %v135_v5, %v133_v6 }
  0xa3   :  { %137 = vst [vmem:[#allocation3] sm:$0x1] %v136_v7 }
  0xa4   :  { %167 = shalt.err (!%p164_p4)
}
  0xa5   :  { %s168_s9 = scalar_lea.hbm %s247_s3, 16 }
  0xa6   :  { %p169_p5 = scmp.ne.s32.totalorder %s247_s3, %s168_s9  ;;  %p172_p6 = scmp.lt.u32.totalorder %s168_s9, %s247_s3 }
  0xa8   :  { %p174_p7 = pnand %p172_p6, %p169_p5 }
  0xaa   :  { %177 = shalt.err (!%p174_p7)
}
  0xab   :  { %147 = dma.vmem_to_hbm [thread:$0]  %s145_s4, 16, %s247_s3, [#allocation4]  }
  0xac   :  { %178 = dma.done.wait [#allocation4], 16  }
  0xad   :  { %179 = vsyncadd [#allocation4], 4294967280 }
  0xae   :  { %151 = vsyncpa [#allocation4], 1 }

</bundles_post_ra>
